<compile_context>
chip_gen: v5e
topology: v5e:2x2
jax: 0.10.0
libtpu: 0.0.40
codegen_flags: <defaults>
</compile_context>

<pallas_src>
import functools

import jax
import jax.numpy as jnp
from jax.experimental import pallas as pl
from jax.experimental.pallas import tpu as pltpu


def _toeplitz_weights(w, W):
    """(3, 3, Cin, Cout) conv kernel -> (3, W*Cin, W*Cout) banded matrices.

    Built over the UNPADDED width:
      T[dy, win*Cin + ci, wout*Cout + co] = w[dy, win - wout + 1, ci, co]
    when |win - wout| <= 1, else 0.  Horizontal taps that would read the
    zero-padded columns simply drop, which is exactly what zero padding does.
    One input row (all W positions, all Cin) @ T[dy] produces a whole output
    row's contribution for vertical tap dy.  Exact gather + mask (no matmul),
    so weight values are bit-identical to the originals.
    """
    KH, KW, Cin, Cout = w.shape
    win = jnp.arange(W)[:, None]              # input column index
    wout = jnp.arange(W)[None, :]             # output column index
    dx = win - wout + 1                       # horizontal tap for (win, wout)
    valid = (dx >= 0) & (dx < KW)
    dx_c = jnp.clip(dx, 0, KW - 1)
    t = w[:, dx_c]                            # (KH, W, W, Cin, Cout)
    t = t * valid[None, :, :, None, None].astype(w.dtype)
    t = jnp.transpose(t, (0, 1, 3, 2, 4))     # (KH, W, Cin, W, Cout)
    return t.reshape(KH, W * Cin, W * Cout)


def _conv_block_kernel(H, W, Cin, Cout,
                       x_ref, t1_ref, b1_ref, t2_ref, b2_ref, o_ref,
                       xpad_ref, h1pad_ref):
    """One batch element.
    x_ref:  (1, H, W*Cin)          input image, W/C flattened into lanes
    t1_ref: (3, W*Cin, W*Cout)     conv1 banded weights (one slab per dy)
    b1_ref: (1, W*Cout)            conv1 bias, pre-tiled across W
    t2_ref: (3, W*Cout, W*Cout)    conv2 banded weights
    b2_ref: (1, W*Cout)            conv2 bias
    o_ref:  (1, H, W*Cout)         lane-dense output
    xpad_ref:  VMEM (H+2, W*Cin)   vertical-halo'd input (rows 0 / H+1 zero)
    h1pad_ref: VMEM (H+2, W*Cout)  vertical-halo'd intermediate (stays in VMEM)
    """
    f32 = jnp.float32
    WCi = W * Cin
    WCo = W * Cout

    # ---- conv1 --------------------------------------------------------------
    # Zero only the halo rows (interior is fully overwritten each step; scratch
    # persists across grid steps).  Unconditional -> safe under megacore
    # sharding of the parallel grid axis.
    xpad_ref[0:1, :] = jnp.zeros((1, WCi), f32)
    xpad_ref[H + 1:H + 2, :] = jnp.zeros((1, WCi), f32)
    xpad_ref[1:H + 1, :] = x_ref[0]            # full-row, lane-offset-0 store

    acc = jnp.zeros((H, WCo), f32)
    for dy in range(3):                        # static unroll, 3 MXU matmuls
        acc = acc + jnp.dot(xpad_ref[dy:dy + H, :], t1_ref[dy],
                            preferred_element_type=f32)
    h1 = jnp.maximum(acc + b1_ref[...], 0.0)   # bias + ReLU (f32)

    # ---- conv2: intermediate kept in VMEM, same structure -------------------
    h1pad_ref[0:1, :] = jnp.zeros((1, WCo), f32)
    h1pad_ref[H + 1:H + 2, :] = jnp.zeros((1, WCo), f32)
    h1pad_ref[1:H + 1, :] = h1

    acc2 = jnp.zeros((H, WCo), f32)
    for dy in range(3):
        acc2 = acc2 + jnp.dot(h1pad_ref[dy:dy + H, :], t2_ref[dy],
                              preferred_element_type=f32)
    h2 = jnp.maximum(acc2 + b2_ref[...], 0.0)

    # Lane-dense store: last dim W*Cout (=128 here) -> unmasked vst.
    o_ref[0] = h2.astype(o_ref.dtype)


def prepare_params(params, W):
    """One-time weight prep (hoisted off the forward path).

    Returns (t1, b1_row, t2, b2_row) ready for conv_block_nhwc.
    """
    w1, b1, w2, b2 = params
    Cout = w1.shape[-1]
    t1 = _toeplitz_weights(w1, W)                    # (3, W*Cin,  W*Cout)
    t2 = _toeplitz_weights(w2, W)                    # (3, W*Cout, W*Cout)
    b1_row = jnp.tile(b1, W).reshape(1, W * Cout)    # bias broadcast across W
    b2_row = jnp.tile(b2, W).reshape(1, W * Cout)
    return (t1, b1_row, t2, b2_row)


def conv_block_nhwc(x_nhwc, prepared):
    """Fused ConvBlock, NHWC hot path.  x: (N, H, W, Cin) -> (N, H, W, Cout)."""
    t1, b1_row, t2, b2_row = prepared
    N, H, W, Cin = x_nhwc.shape
    Cout = t1.shape[-1] // W

    x2d = x_nhwc.reshape(N, H, W * Cin)              # contiguous flatten (free)
    kernel = functools.partial(_conv_block_kernel, H, W, Cin, Cout)

    out2d = pl.pallas_call(
        kernel,
        out_shape=jax.ShapeDtypeStruct((N, H, W * Cout), x_nhwc.dtype),
        grid_spec=pltpu.PrefetchScalarGridSpec(
            num_scalar_prefetch=0,
            grid=(N,),
            in_specs=[
                pl.BlockSpec((1, H, W * Cin), lambda n: (n, 0, 0)),
                pl.BlockSpec((3, W * Cin, W * Cout), lambda n: (0, 0, 0)),
                pl.BlockSpec((1, W * Cout), lambda n: (0, 0)),
                pl.BlockSpec((3, W * Cout, W * Cout), lambda n: (0, 0, 0)),
                pl.BlockSpec((1, W * Cout), lambda n: (0, 0)),
            ],
            out_specs=pl.BlockSpec((1, H, W * Cout), lambda n: (n, 0, 0)),
            scratch_shapes=[
                pltpu.VMEM((H + 2, W * Cin), jnp.float32),
                pltpu.VMEM((H + 2, W * Cout), jnp.float32),
            ]),
        compiler_params=pltpu.CompilerParams(
            dimension_semantics=("parallel",)),
    )(x2d, t1, b1_row, t2, b2_row)
    return out2d.reshape(N, H, W, Cout)


def conv_block_forward(x_nchw, prepared):
    """ConvBlock forward, NCHW in/out (PyTorch convention).

    NOTE: the transposes are model-boundary layout plumbing only; in a full
    network keep NHWC end-to-end and call conv_block_nhwc directly.
    """
    x_nhwc = jnp.transpose(x_nchw, (0, 2, 3, 1))
    y = conv_block_nhwc(x_nhwc, prepared)
    return jnp.transpose(y, (0, 3, 1, 2))


def init_params(key, in_channels, out_channels):
    """Deterministic init matching PyTorch Conv2d default (uniform +-1/sqrt(fan_in))."""
    k1, k2, k3, k4 = jax.random.split(key, 4)
    fan_in1 = in_channels * 9
    bound1 = 1.0 / jnp.sqrt(fan_in1)
    w1 = jax.random.uniform(k1, (3, 3, in_channels, out_channels),
                            minval=-bound1, maxval=bound1, dtype=jnp.float32)
    b1 = jax.random.uniform(k2, (out_channels,),
                            minval=-bound1, maxval=bound1, dtype=jnp.float32)
    fan_in2 = out_channels * 9
    bound2 = 1.0 / jnp.sqrt(fan_in2)
    w2 = jax.random.uniform(k3, (3, 3, out_channels, out_channels),
                            minval=-bound2, maxval=bound2, dtype=jnp.float32)
    b2 = jax.random.uniform(k4, (out_channels,),
                            minval=-bound2, maxval=bound2, dtype=jnp.float32)
    return (w1, b1, w2, b2)


def _reference_forward(x_nchw, params):
    """Pure-JAX reference (lax conv) for the correctness check."""
    w1, b1, w2, b2 = params

    def conv(x, w, b):
        w_oihw = jnp.transpose(w, (3, 2, 0, 1))
        y = jax.lax.conv_general_dilated(
            x, w_oihw, window_strides=(1, 1), padding=((1, 1), (1, 1)),
            dimension_numbers=("NCHW", "OIHW", "NCHW"))
        return jnp.maximum(y + b[None, :, None, None], 0.0)

    return conv(conv(x_nchw, w1, b1), w2, b2)


if __name__ == "__main__":
    key = jax.random.PRNGKey(0)
    k_x, k_p = jax.random.split(key)

    N, Cin, Cout, H, W = 2, 4, 8, 16, 16
    x = jax.random.normal(k_x, (N, Cin, H, W), dtype=jnp.float32)
    params = init_params(k_p, Cin, Cout)

    # Weight prep done ONCE, off the per-forward hot path.
    prepared = jax.block_until_ready(prepare_params(params, W))

    fwd = jax.jit(conv_block_forward)
    out = jax.block_until_ready(fwd(x, prepared))
    ref = jax.block_until_ready(_reference_forward(x, params))

    assert out.shape == (N, Cout, H, W)
    assert jnp.max(jnp.abs(out - ref)) < 1e-4

    print("KERNEL_OK")
</pallas_src>

<mosaic_0001>
module attributes {stable_mosaic.version = 11 : i64} {
  func.func @_conv_block_kernel(%arg0: i32, %arg1: memref<1x16x64xf32, #tpu.memory_space<vmem>>, %arg2: memref<3x64x128xf32, #tpu.memory_space<vmem>>, %arg3: memref<1x128xf32, #tpu.memory_space<vmem>>, %arg4: memref<3x128x128xf32, #tpu.memory_space<vmem>>, %arg5: memref<1x128xf32, #tpu.memory_space<vmem>>, %arg6: memref<1x16x128xf32, #tpu.memory_space<vmem>>, %arg7: memref<18x64xf32, #tpu.memory_space<vmem>>, %arg8: memref<18x128xf32, #tpu.memory_space<vmem>>) attributes {dimension_semantics = [#tpu.dimension_semantics<parallel>], iteration_bounds = array<i64: 2>, scalar_prefetch = 0 : i64, scratch_operands = 2 : i64, tpu.core_type = #tpu.core_type<tc>, window_params = [{transform_indices = @transform_0, window_bounds = array<i64: 1, 16, 64>}, {pipeline_mode = #tpu.pipeline_mode<synchronous>, transform_indices = @transform_1, window_bounds = array<i64: 3, 64, 128>}, {pipeline_mode = #tpu.pipeline_mode<synchronous>, transform_indices = @transform_2, window_bounds = array<i64: 1, 128>}, {pipeline_mode = #tpu.pipeline_mode<synchronous>, transform_indices = @transform_3, window_bounds = array<i64: 3, 128, 128>}, {pipeline_mode = #tpu.pipeline_mode<synchronous>, transform_indices = @transform_4, window_bounds = array<i64: 1, 128>}, {transform_indices = @transform_5, window_bounds = array<i64: 1, 16, 128>}]} {
    %cst = arith.constant 0.000000e+00 : f32
    %0 = vector.broadcast %cst : f32 to vector<1x64xf32>
    %c0 = arith.constant 0 : index
    %c0_0 = arith.constant 0 : index
    %1 = vector.load %arg7[%c0, %c0_0] : memref<18x64xf32, #tpu.memory_space<vmem>>, vector<1x64xf32>
    tpu.vector_store %arg7[%c0, %c0_0], %0 {strides = array<i32>} : memref<18x64xf32, #tpu.memory_space<vmem>>, vector<1x64xf32>,
    %cst_1 = arith.constant 0.000000e+00 : f32
    %2 = vector.broadcast %cst_1 : f32 to vector<1x64xf32>
    %c17 = arith.constant 17 : index
    %c0_2 = arith.constant 0 : index
    %3 = vector.load %arg7[%c17, %c0_2] : memref<18x64xf32, #tpu.memory_space<vmem>>, vector<1x64xf32>
    tpu.vector_store %arg7[%c17, %c0_2], %2 {strides = array<i32>} : memref<18x64xf32, #tpu.memory_space<vmem>>, vector<1x64xf32>,
    %c0_3 = arith.constant 0 : index
    %c0_4 = arith.constant 0 : index
    %c0_5 = arith.constant 0 : index
    %4 = vector.load %arg1[%c0_3, %c0_4, %c0_5] : memref<1x16x64xf32, #tpu.memory_space<vmem>>, vector<1x16x64xf32>
    %5 = vector.shape_cast %4 : vector<1x16x64xf32> to vector<16x64xf32>
    %c1 = arith.constant 1 : index
    %c0_6 = arith.constant 0 : index
    %6 = vector.load %arg7[%c1, %c0_6] : memref<18x64xf32, #tpu.memory_space<vmem>>, vector<16x64xf32>
    tpu.vector_store %arg7[%c1, %c0_6], %5 {strides = array<i32>} : memref<18x64xf32, #tpu.memory_space<vmem>>, vector<16x64xf32>,
    %cst_7 = arith.constant 0.000000e+00 : f32
    %7 = vector.broadcast %cst_7 : f32 to vector<16x128xf32>
    %c0_8 = arith.constant 0 : index
    %c0_9 = arith.constant 0 : index
    %8 = vector.load %arg7[%c0_8, %c0_9] : memref<18x64xf32, #tpu.memory_space<vmem>>, vector<16x64xf32>
    %c0_10 = arith.constant 0 : index
    %c0_11 = arith.constant 0 : index
    %c0_12 = arith.constant 0 : index
    %9 = vector.load %arg2[%c0_10, %c0_11, %c0_12] : memref<3x64x128xf32, #tpu.memory_space<vmem>>, vector<1x64x128xf32>
    %10 = vector.shape_cast %9 : vector<1x64x128xf32> to vector<64x128xf32>
    %cst_13 = arith.constant dense<0.000000e+00> : vector<16x128xf32>
    %11 = tpu.matmul %8, %10, %cst_13 {dimension_numbers = #tpu.dot_dimension_numbers<[1], [0], [0], [1], [0, 0, 1, 1], [], []>} : vector<16x64xf32>, vector<64x128xf32>, vector<16x128xf32> -> vector<16x128xf32>
    %12 = arith.addf %7, %11 : vector<16x128xf32>
    %c1_14 = arith.constant 1 : index
    %c0_15 = arith.constant 0 : index
    %13 = vector.load %arg7[%c1_14, %c0_15] : memref<18x64xf32, #tpu.memory_space<vmem>>, vector<16x64xf32>
    %c1_16 = arith.constant 1 : index
    %c0_17 = arith.constant 0 : index
    %c0_18 = arith.constant 0 : index
    %14 = vector.load %arg2[%c1_16, %c0_17, %c0_18] : memref<3x64x128xf32, #tpu.memory_space<vmem>>, vector<1x64x128xf32>
    %15 = vector.shape_cast %14 : vector<1x64x128xf32> to vector<64x128xf32>
    %cst_19 = arith.constant dense<0.000000e+00> : vector<16x128xf32>
    %16 = tpu.matmul %13, %15, %cst_19 {dimension_numbers = #tpu.dot_dimension_numbers<[1], [0], [0], [1], [0, 0, 1, 1], [], []>} : vector<16x64xf32>, vector<64x128xf32>, vector<16x128xf32> -> vector<16x128xf32>
    %17 = arith.addf %12, %16 : vector<16x128xf32>
    %c2 = arith.constant 2 : index
    %c0_20 = arith.constant 0 : index
    %18 = vector.load %arg7[%c2, %c0_20] : memref<18x64xf32, #tpu.memory_space<vmem>>, vector<16x64xf32>
    %c2_21 = arith.constant 2 : index
    %c0_22 = arith.constant 0 : index
    %c0_23 = arith.constant 0 : index
    %19 = vector.load %arg2[%c2_21, %c0_22, %c0_23] : memref<3x64x128xf32, #tpu.memory_space<vmem>>, vector<1x64x128xf32>
    %20 = vector.shape_cast %19 : vector<1x64x128xf32> to vector<64x128xf32>
    %cst_24 = arith.constant dense<0.000000e+00> : vector<16x128xf32>
    %21 = tpu.matmul %18, %20, %cst_24 {dimension_numbers = #tpu.dot_dimension_numbers<[1], [0], [0], [1], [0, 0, 1, 1], [], []>} : vector<16x64xf32>, vector<64x128xf32>, vector<16x128xf32> -> vector<16x128xf32>
    %22 = arith.addf %17, %21 : vector<16x128xf32>
    %c0_25 = arith.constant 0 : index
    %c0_26 = arith.constant 0 : index
    %23 = vector.load %arg3[%c0_25, %c0_26] : memref<1x128xf32, #tpu.memory_space<vmem>>, vector<1x128xf32>
    %24 = vector.broadcast %23 : vector<1x128xf32> to vector<16x128xf32>
    %25 = arith.addf %22, %24 : vector<16x128xf32>
    %cst_27 = arith.constant 0.000000e+00 : f32
    %26 = vector.broadcast %cst_27 : f32 to vector<16x128xf32>
    %27 = arith.maximumf %25, %26 : vector<16x128xf32>
    %cst_28 = arith.constant 0.000000e+00 : f32
    %28 = vector.broadcast %cst_28 : f32 to vector<1x128xf32>
    %c0_29 = arith.constant 0 : index
    %c0_30 = arith.constant 0 : index
    %29 = vector.load %arg8[%c0_29, %c0_30] : memref<18x128xf32, #tpu.memory_space<vmem>>, vector<1x128xf32>
    tpu.vector_store %arg8[%c0_29, %c0_30], %28 {strides = array<i32>} : memref<18x128xf32, #tpu.memory_space<vmem>>, vector<1x128xf32>,
    %cst_31 = arith.constant 0.000000e+00 : f32
    %30 = vector.broadcast %cst_31 : f32 to vector<1x128xf32>
    %c17_32 = arith.constant 17 : index
    %c0_33 = arith.constant 0 : index
    %31 = vector.load %arg8[%c17_32, %c0_33] : memref<18x128xf32, #tpu.memory_space<vmem>>, vector<1x128xf32>
    tpu.vector_store %arg8[%c17_32, %c0_33], %30 {strides = array<i32>} : memref<18x128xf32, #tpu.memory_space<vmem>>, vector<1x128xf32>,
    %c1_34 = arith.constant 1 : index
    %c0_35 = arith.constant 0 : index
    %32 = vector.load %arg8[%c1_34, %c0_35] : memref<18x128xf32, #tpu.memory_space<vmem>>, vector<16x128xf32>
    tpu.vector_store %arg8[%c1_34, %c0_35], %27 {strides = array<i32>} : memref<18x128xf32, #tpu.memory_space<vmem>>, vector<16x128xf32>,
    %cst_36 = arith.constant 0.000000e+00 : f32
    %33 = vector.broadcast %cst_36 : f32 to vector<16x128xf32>
    %c0_37 = arith.constant 0 : index
    %c0_38 = arith.constant 0 : index
    %34 = vector.load %arg8[%c0_37, %c0_38] : memref<18x128xf32, #tpu.memory_space<vmem>>, vector<16x128xf32>
    %c0_39 = arith.constant 0 : index
    %c0_40 = arith.constant 0 : index
    %c0_41 = arith.constant 0 : index
    %35 = vector.load %arg4[%c0_39, %c0_40, %c0_41] : memref<3x128x128xf32, #tpu.memory_space<vmem>>, vector<1x128x128xf32>
    %36 = vector.shape_cast %35 : vector<1x128x128xf32> to vector<128x128xf32>
    %cst_42 = arith.constant dense<0.000000e+00> : vector<16x128xf32>
    %37 = tpu.matmul %34, %36, %cst_42 {dimension_numbers = #tpu.dot_dimension_numbers<[1], [0], [0], [1], [0, 0, 1, 1], [], []>} : vector<16x128xf32>, vector<128x128xf32>, vector<16x128xf32> -> vector<16x128xf32>
    %38 = arith.addf %33, %37 : vector<16x128xf32>
    %c1_43 = arith.constant 1 : index
    %c0_44 = arith.constant 0 : index
    %39 = vector.load %arg8[%c1_43, %c0_44] : memref<18x128xf32, #tpu.memory_space<vmem>>, vector<16x128xf32>
    %c1_45 = arith.constant 1 : index
    %c0_46 = arith.constant 0 : index
    %c0_47 = arith.constant 0 : index
    %40 = vector.load %arg4[%c1_45, %c0_46, %c0_47] : memref<3x128x128xf32, #tpu.memory_space<vmem>>, vector<1x128x128xf32>
    %41 = vector.shape_cast %40 : vector<1x128x128xf32> to vector<128x128xf32>
    %cst_48 = arith.constant dense<0.000000e+00> : vector<16x128xf32>
    %42 = tpu.matmul %39, %41, %cst_48 {dimension_numbers = #tpu.dot_dimension_numbers<[1], [0], [0], [1], [0, 0, 1, 1], [], []>} : vector<16x128xf32>, vector<128x128xf32>, vector<16x128xf32> -> vector<16x128xf32>
    %43 = arith.addf %38, %42 : vector<16x128xf32>
    %c2_49 = arith.constant 2 : index
    %c0_50 = arith.constant 0 : index
    %44 = vector.load %arg8[%c2_49, %c0_50] : memref<18x128xf32, #tpu.memory_space<vmem>>, vector<16x128xf32>
    %c2_51 = arith.constant 2 : index
    %c0_52 = arith.constant 0 : index
    %c0_53 = arith.constant 0 : index
    %45 = vector.load %arg4[%c2_51, %c0_52, %c0_53] : memref<3x128x128xf32, #tpu.memory_space<vmem>>, vector<1x128x128xf32>
    %46 = vector.shape_cast %45 : vector<1x128x128xf32> to vector<128x128xf32>
    %cst_54 = arith.constant dense<0.000000e+00> : vector<16x128xf32>
    %47 = tpu.matmul %44, %46, %cst_54 {dimension_numbers = #tpu.dot_dimension_numbers<[1], [0], [0], [1], [0, 0, 1, 1], [], []>} : vector<16x128xf32>, vector<128x128xf32>, vector<16x128xf32> -> vector<16x128xf32>
    %48 = arith.addf %43, %47 : vector<16x128xf32>
    %c0_55 = arith.constant 0 : index
    %c0_56 = arith.constant 0 : index
    %49 = vector.load %arg5[%c0_55, %c0_56] : memref<1x128xf32, #tpu.memory_space<vmem>>, vector<1x128xf32>
    %50 = vector.broadcast %49 : vector<1x128xf32> to vector<16x128xf32>
    %51 = arith.addf %48, %50 : vector<16x128xf32>
    %cst_57 = arith.constant 0.000000e+00 : f32
    %52 = vector.broadcast %cst_57 : f32 to vector<16x128xf32>
    %53 = arith.maximumf %51, %52 : vector<16x128xf32>
    %c0_58 = arith.constant 0 : index
    %c0_59 = arith.constant 0 : index
    %c0_60 = arith.constant 0 : index
    %54 = vector.load %arg6[%c0_58, %c0_59, %c0_60] : memref<1x16x128xf32, #tpu.memory_space<vmem>>, vector<1x16x128xf32>
    %55 = vector.shape_cast %54 : vector<1x16x128xf32> to vector<16x128xf32>
    %56 = vector.shape_cast %53 : vector<16x128xf32> to vector<1x16x128xf32>
    tpu.vector_store %arg6[%c0_58, %c0_59, %c0_60], %56 {strides = array<i32>} : memref<1x16x128xf32, #tpu.memory_space<vmem>>, vector<1x16x128xf32>,
    return
  }
  func.func @transform_0(%arg0: i32) -> (i32, i32, i32) {
    %c0_i32 = arith.constant 0 : i32
    %c0_i32_0 = arith.constant 0 : i32
    %c0_i32_1 = arith.constant 0 : i32
    return %arg0, %c0_i32, %c0_i32_0 : i32, i32, i32
  }
  func.func @transform_1(%arg0: i32) -> (i32, i32, i32) {
    %c0_i32 = arith.constant 0 : i32
    %c0_i32_0 = arith.constant 0 : i32
    %c0_i32_1 = arith.constant 0 : i32
    %c0_i32_2 = arith.constant 0 : i32
    return %c0_i32, %c0_i32_0, %c0_i32_1 : i32, i32, i32
  }
  func.func @transform_2(%arg0: i32) -> (i32, i32) {
    %c0_i32 = arith.constant 0 : i32
    %c0_i32_0 = arith.constant 0 : i32
    %c0_i32_1 = arith.constant 0 : i32
    return %c0_i32, %c0_i32_0 : i32, i32
  }
  func.func @transform_3(%arg0: i32) -> (i32, i32, i32) {
    %c0_i32 = arith.constant 0 : i32
    %c0_i32_0 = arith.constant 0 : i32
    %c0_i32_1 = arith.constant 0 : i32
    %c0_i32_2 = arith.constant 0 : i32
    return %c0_i32, %c0_i32_0, %c0_i32_1 : i32, i32, i32
  }
  func.func @transform_4(%arg0: i32) -> (i32, i32) {
    %c0_i32 = arith.constant 0 : i32
    %c0_i32_0 = arith.constant 0 : i32
    %c0_i32_1 = arith.constant 0 : i32
    return %c0_i32, %c0_i32_0 : i32, i32
  }
  func.func @transform_5(%arg0: i32) -> (i32, i32, i32) {
    %c0_i32 = arith.constant 0 : i32
    %c0_i32_0 = arith.constant 0 : i32
    %c0_i32_1 = arith.constant 0 : i32
    return %arg0, %c0_i32, %c0_i32_0 : i32, i32, i32
  }
}

</mosaic_0001>

<bundles_post_ra>
// kernel: conv_block_forward.1
= control target key start
LH: loop header
LB: loop body
LE: loop exit
PB: predicated region body
PF: predicated region fallthrough
CT: control target
= control target key end

     0   :  { %10 = vsyncpa [#allocation5], 0  ;;  %s740_s18 = smov 0   ;;  %s925_s0 = inlined_call_operand.vmem [shape: f32[2,16,64], index: 0, kind: input, shape index: {}]   ;;  %s926_s1 = inlined_call_operand.hbm [shape: f32[3,64,128], index: 1, kind: input, shape index: {}]   ;;  %s927_s2 = inlined_call_operand.vmem [shape: f32[1,128], index: 2, kind: input, shape index: {}]   ;;  %s928_s3 = inlined_call_operand.vmem [shape: f32[3,128,128], index: 3, kind: input, shape index: {}]   ;;  %s929_s4 = inlined_call_operand.vmem [shape: f32[1,128], index: 4, kind: input, shape index: {}]   ;;  %s930_s5 = inlined_call_operand.vmem [shape: f32[2,16,128], index: 5, kind: output, shape index: {}]  }
   0x1 LB: > { %s168_s21 = sshll.u32 %s926_s1, 4  ;;  %s587_s22 = sadd.s32 4294967295, %s704_s18   ;;  %s704_s18 = sphi %s740_s18, %s16_s18   ;;  %s169_s21 = int_to_ptr.hbm [resolvable:$true] %s168_s21 }
   0x2   : > { %p589_p0 = scmp.ge.s32.totalorder %s704_s18, 1  ;;  %p157_p1 = scmp.lt.s32.totalorder %s704_s18, 3 }
   0x3   : > { %p648_p2 = scmp.eq.s32.totalorder %s587_s22, 0  ;;  %s706_s23 = smov [#allocation4]  }
   0x4   : > { %p158_p3 = pnand %p589_p0, %p157_p1  ;;  %s170_s24 = sshll.u32 %s706_s23, 4  ;;  %s171_s24 = int_to_ptr.vmem [resolvable:$true] %s170_s24 }
   0x5   : > { %s707_s25 = smov 128   ;;  %s708_s26 = smov 8  }
   0x6   : > { %p644_p4 = pneg %p158_p3  ;;  %203 = sbr.rel (%p158_p3) target bundleno = 340 (0x154), region = 40 }
   0x8   : > { %p645_p5 = pnand %p648_p2, %p644_p4 }
   0xa   : > { %647 = dma.hbm_to_vmem [thread:$0]  (!%p645_p5), %s169_s21, 3072, %s171_s24, [#allocation5], %s707_s25, %s707_s25, %s708_s26  }
   0xb   : > { %699 = dma.done.wait (%p648_p2), [#allocation5], 3072  }
   0xc   : > { %701 = vsyncadd (%p648_p2), [#allocation5], 4294964224  ;;  %p232_p6 = scmp.lt.s32.totalorder %s587_s22, 1  ;;  %vm242_vm0 = vcmask 516096   ;;  %v709_v0 = vmov 0.0   ;;  %v270_v1 = vld [vmem:[#allocation4 + $0x78] sm:$0xff] }
   0xd   : > { %243 = vst.msk [vmem:[#allocation2] sm:$0x1] %vm242_vm0, %v709_v0  ;;  %v269_v2 = vld [vmem:[#allocation4 + $0x70] sm:$0xff]  ;;  %285 = vmatpush.msra.mxu2 %v270_v1  ;;  %v259_v3 = vld [vmem:[#allocation4 + $0x38] sm:$0xff]  ;;  %v268_v4 = vld [vmem:[#allocation4 + $0x68] sm:$0xff]  ;;  %vm247_vm1 = vcmask 523264  }
   0xe   : > { %s932_s22 = smov (!%p232_p6, %s587_s22), 1  ;;  %244 = vst.msk [vmem:[#allocation2 + $0x11] sm:$0x1] %vm242_vm0, %v709_v0  ;;  %314 = vmatpush.msra.mxu1 %v259_v3  ;;  %v258_v5 = vld [vmem:[#allocation4 + $0x30] sm:$0xff]  ;;  %v257_v6 = vld [vmem:[#allocation4 + $0x28] sm:$0xff]  ;;  %v267_v7 = vld [vmem:[#allocation4 + $0x60] sm:$0xff] }
   0xf   : > { %379 = vst [vmem:[#allocation3] sm:$0x1] %v709_v0  ;;  %s638_s27 = sshll.u32 %s932_s22, 4  ;;  %286 = vmatpush.msra.mxu2 %v269_v2  ;;  %v256_v10 = vld [vmem:[#allocation4 + $0x20] sm:$0xff]  ;;  %v266_v11 = vld [vmem:[#allocation4 + $0x58] sm:$0xff]  ;;  %v265_v13 = vld [vmem:[#allocation4 + $0x50] sm:$0xff] }
  0x10   : > { %380 = vst [vmem:[#allocation3 + $0x11] sm:$0x1] %v709_v0  ;;  %s236_s30 = scalar_lea.vmem %s925_s0, %s638_s27  ;;  %315 = vmatpush.msra.mxu1 %v258_v5  ;;  %v255_v12 = vld [vmem:[#allocation4 + $0x18] sm:$0xff]  ;;  %v254_v14 = vld [vmem:[#allocation4 + $0x10] sm:$0xff]  ;;  %v264_v15 = vld [vmem:[#allocation4 + $0x48] sm:$0xff]  ;;  %s241_s21 = scalar_lea.vmem %s930_s5, %s638_s27 }
  0x11   : > { %v245_v8 = vld [vmem:[%s236_s30] sm:$0xff]  ;;  %v246_v9 = vld [vmem:[%s236_s30 + $0x8] sm:$0xff]  ;;  %287 = vmatpush.msra.mxu2 %v268_v4  ;;  %v253_v16 = vld [vmem:[#allocation4 + $0x8] sm:$0xff] }
  0x12   : > { %248 = vst.msk [vmem:[#allocation2 + $0x1] sm:$0xff] %vm247_vm1, %v245_v8  ;;  %316 = vmatpush.msra.mxu1 %v257_v6  ;;  %v263_v17 = vld [vmem:[#allocation4 + $0x40] sm:$0xff]  ;;  %v339_v20 = vld [vmem:[#allocation4 + $0xb8] sm:$0xff]  ;;  %v338_v22 = vld [vmem:[#allocation4 + $0xb0] sm:$0xff] }
  0x13   : > { %249 = vst.msk [vmem:[#allocation2 + $0x9] sm:$0xff] %vm247_vm1, %v246_v9  ;;  %288 = vmatpush.msra.mxu2 %v267_v7  ;;  %v252_v19 = vld [vmem:[#allocation4] sm:$0xff]  ;;  %v337_v23 = vld [vmem:[#allocation4 + $0xa8] sm:$0xff]  ;;  %v335_v26 = vld [vmem:[#allocation4 + $0x98] sm:$0xff] }
  0x14   : > { %317 = vmatpush.msra.mxu1 %v256_v10  ;;  %v336_v24 = vld [vmem:[#allocation4 + $0xa0] sm:$0xff]  ;;  %v334_v28 = vld [vmem:[#allocation4 + $0x90] sm:$0xff]  ;;  %v333_v29 = vld [vmem:[#allocation4 + $0x88] sm:$0xff] }
  0x15   : > { %289 = vmatpush.msra.mxu2 %v266_v11  ;;  %v332_v30 = vld [vmem:[#allocation4 + $0x80] sm:$0xff]  ;;  %v619_v33 = vld [vmem:[%s928_s3 + $0xf8] sm:$0xff]  ;;  %v617_v35 = vld [vmem:[%s928_s3 + $0xe8] sm:$0xff] }
  0x16   : > { %318 = vmatpush.msra.mxu1 %v255_v12  ;;  %420 = vmatpush.msra.mxu3 %v619_v33  ;;  %v618_v34 = vld [vmem:[%s928_s3 + $0xf0] sm:$0xff]  ;;  %v616_v36 = vld [vmem:[%s928_s3 + $0xe0] sm:$0xff]  ;;  %v400_v37 = vld [vmem:[%s928_s3 + $0x78] sm:$0xff] }
  0x17   : > { %290 = vmatpush.msra.mxu2 %v265_v13  ;;  %v615_v38 = vld [vmem:[%s928_s3 + $0xd8] sm:$0xff]  ;;  %443 = vmatpush.msra.mxu0 %v400_v37  ;;  %v399_v39 = vld [vmem:[%s928_s3 + $0x70] sm:$0xff]  ;;  %v398_v40 = vld [vmem:[%s928_s3 + $0x68] sm:$0xff] }
  0x18   : > { %319 = vmatpush.msra.mxu1 %v254_v14  ;;  %421 = vmatpush.msra.mxu3 %v618_v34  ;;  %v614_v41 = vld [vmem:[%s928_s3 + $0xd0] sm:$0xff]  ;;  %v397_v42 = vld [vmem:[%s928_s3 + $0x60] sm:$0xff]  ;;  %v613_v43 = vld [vmem:[%s928_s3 + $0xc8] sm:$0xff] }
  0x19   : > { %291 = vmatpush.msra.mxu2 %v264_v15  ;;  %v260_v18 = vld [vmem:[#allocation2 + $0x1] sm:$0xff]  ;;  %444 = vmatpush.msra.mxu0 %v399_v39  ;;  %v396_v45 = vld [vmem:[%s928_s3 + $0x58] sm:$0xff]  ;;  %v395_v48 = vld [vmem:[%s928_s3 + $0x50] sm:$0xff] }
  0x1a   : > { %320 = vmatpush.msra.mxu1 %v253_v16  ;;  %v250_v21 = vld [vmem:[#allocation2] sm:$0xff]  ;;  %v261_v25 = vld [vmem:[#allocation2 + $0x9] sm:$0xff]  ;;  %422 = vmatpush.msra.mxu3 %v617_v35  ;;  %v635_v46 = vld [vmem:[%s928_s3 + $0x178] sm:$0xff] }
  0x1b   : > { %292 = vmatpush.msra.mxu2 %v263_v17  ;;  %v251_v27 = vld [vmem:[#allocation2 + $0x8] sm:$0xff]  ;;  %445 = vmatpush.msra.mxu0 %v398_v40  ;;  %v612_v44 = vld [vmem:[%s928_s3 + $0xc0] sm:$0xff]  ;;  %v611_v47 = vld [vmem:[%s928_s3 + $0xb8] sm:$0xff] }
  0x1c   : > { %598 = vmatmul.msk.f32.vlgmr.msra.gmra.mxu2 %vm247_vm1, %v260_v18  ;;  %321 = vmatpush.msra.mxu1 %v252_v19  ;;  %v329_v31 = vld [vmem:[#allocation2 + $0x2] sm:$0xff]  ;;  %v330_v32 = vld [vmem:[#allocation2 + $0xa] sm:$0xff]  ;;  %v392_v57 = vld [vmem:[%s928_s3 + $0x38] sm:$0xff] }
  0x1d   : > { %354 = vmatpush.msrb.mxu2 %v339_v20  ;;  %600 = vmatmul.msk.f32.vlgmr.msra.gmra.mxu1 %vm247_vm1, %v250_v21  ;;  %v634_v49 = vld [vmem:[%s928_s3 + $0x170] sm:$0xff]  ;;  %v394_v50 = vld [vmem:[%s928_s3 + $0x48] sm:$0xff]  ;;  %v393_v52 = vld [vmem:[%s928_s3 + $0x40] sm:$0xff] }
  0x1e   : > { %423 = vmatpush.msra.mxu3 %v616_v36  ;;  %446 = vmatpush.msra.mxu0 %v397_v42  ;;  %v633_v51 = vld [vmem:[%s928_s3 + $0x168] sm:$0xff]  ;;  %v632_v53 = vld [vmem:[%s928_s3 + $0x160] sm:$0xff]  ;;  %v610_v54 = vld [vmem:[%s928_s3 + $0xb0] sm:$0xff] }
  0x1f   : > { %355 = vmatpush.msrb.mxu2 %v338_v22  ;;  %485 = vmatpush.msrb.mxu1 %v635_v46  ;;  %v609_v55 = vld [vmem:[%s928_s3 + $0xa8] sm:$0xff]  ;;  %v608_v56 = vld [vmem:[%s928_s3 + $0xa0] sm:$0xff]  ;;  %v631_v58 = vld [vmem:[%s928_s3 + $0x158] sm:$0xff] }
  0x20   : > { %424 = vmatpush.msra.mxu3 %v615_v38  ;;  %447 = vmatpush.msra.mxu0 %v396_v45  ;;  %v607_v59 = vld [vmem:[%s928_s3 + $0x98] sm:$0xff]  ;;  %v391_v60 = vld [vmem:[%s928_s3 + $0x30] sm:$0xff]  ;;  %v390_v63 = vld [vmem:[%s928_s3 + $0x28] sm:$0xff] }
  0x21   : > { %356 = vmatpush.msrb.mxu2 %v337_v23  ;;  %486 = vmatpush.msrb.mxu1 %v634_v49  ;;  %v630_v61 = vld [vmem:[%s928_s3 + $0x150] sm:$0xff]  ;;  %v629_v0 = vld [vmem:[%s928_s3 + $0x148] sm:$0xff]  ;;  %v389_v2 = vld [vmem:[%s928_s3 + $0x20] sm:$0xff] }
  0x22   : > { %425 = vmatpush.msra.mxu3 %v614_v41  ;;  %448 = vmatpush.msra.mxu0 %v395_v48  ;;  %v606_v62 = vld [vmem:[%s928_s3 + $0x90] sm:$0xff]  ;;  %v605_v1 = vld [vmem:[%s928_s3 + $0x88] sm:$0xff]  ;;  %v628_v3 = vld [vmem:[%s928_s3 + $0x140] sm:$0xff] }
  0x23   : > { %357 = vmatpush.msrb.mxu2 %v336_v24  ;;  %487 = vmatpush.msrb.mxu1 %v633_v51  ;;  %v604_v4 = vld [vmem:[%s928_s3 + $0x80] sm:$0xff]  ;;  %v388_v5 = vld [vmem:[%s928_s3 + $0x18] sm:$0xff]  ;;  %v387_v7 = vld [vmem:[%s928_s3 + $0x10] sm:$0xff] }
  0x24   : > { %599 = vmatmul.msk.f32.gmra.mxu2 %vm247_vm1, %v261_v25  ;;  %426 = vmatpush.msra.mxu3 %v613_v43  ;;  %v627_v6 = vld [vmem:[%s928_s3 + $0x138] sm:$0xff]  ;;  %v626_v8 = vld [vmem:[%s928_s3 + $0x130] sm:$0xff]  ;;  %v386_v9 = vld [vmem:[%s928_s3 + $0x8] sm:$0xff] }
  0x25   : > { %358 = vmatpush.msrb.mxu2 %v335_v26  ;;  %601 = vmatmul.msk.f32.gmra.mxu1 %vm247_vm1, %v251_v27  ;;  %v625_v10 = vld [vmem:[%s928_s3 + $0x128] sm:$0xff]  ;;  %v385_v11 = vld [vmem:[%s928_s3] sm:$0xff]  ;;  %v623_v13 = vld [vmem:[%s928_s3 + $0x118] sm:$0xff] }
  0x26   : > { %427 = vmatpush.msra.mxu3 %v612_v44  ;;  %449 = vmatpush.msra.mxu0 %v394_v50  ;;  %v624_v12 = vld [vmem:[%s928_s3 + $0x120] sm:$0xff]  ;;  %v622_v14 = vld [vmem:[%s928_s3 + $0x110] sm:$0xff]  ;;  %v621_v16 = vld [vmem:[%s928_s3 + $0x108] sm:$0xff] }
  0x27   : > { %359 = vmatpush.msrb.mxu2 %v334_v28  ;;  %488 = vmatpush.msrb.mxu1 %v632_v53  ;;  %v620_v17 = vld [vmem:[%s928_s3 + $0x100] sm:$0xff] }
  0x28   : > { %428 = vmatpush.msra.mxu3 %v611_v47  ;;  %450 = vmatpush.msra.mxu0 %v393_v52  ;;  %v662_v21 = vld [vmem:[%s927_s2] ss:$0 sm:$0xff] }
  0x29   : > { %360 = vmatpush.msrb.mxu2 %v333_v29  ;;  %489 = vmatpush.msrb.mxu1 %v631_v58  ;;  %v663_v39 = vld [vmem:[%s929_s4] ss:$0 sm:$0xff] }
  0x2a   : > { %429 = vmatpush.msra.mxu3 %v610_v54  ;;  %451 = vmatpush.msra.mxu0 %v392_v57 }
  0x2b   : > { %361 = vmatpush.msrb.mxu2 %v332_v30  ;;  %490 = vmatpush.msrb.mxu1 %v630_v61 }
  0x2c   : > { %602 = vmatmul.msk.f32.vlgmr.msrb.gmra.mxu2 %vm247_vm1, %v329_v31  ;;  %430 = vmatpush.msra.mxu3 %v609_v55 }
  0x2d   : > { %452 = vmatpush.msra.mxu0 %v391_v60  ;;  %491 = vmatpush.msrb.mxu1 %v629_v0 }
  0x2e   : > { %431 = vmatpush.msra.mxu3 %v608_v56 }
  0x2f   : > { %453 = vmatpush.msra.mxu0 %v390_v63  ;;  %492 = vmatpush.msrb.mxu1 %v628_v3 }
  0x30   : > { %432 = vmatpush.msra.mxu3 %v607_v59 }
  0x31   : > { %454 = vmatpush.msra.mxu0 %v389_v2  ;;  %493 = vmatpush.msrb.mxu1 %v627_v6 }
  0x32   : > { %433 = vmatpush.msra.mxu3 %v606_v62 }
  0x33   : > { %455 = vmatpush.msra.mxu0 %v388_v5  ;;  %494 = vmatpush.msrb.mxu1 %v626_v8 }
  0x34   : > { %603 = vmatmul.msk.f32.gmra.mxu2 %vm247_vm1, %v330_v32  ;;  %434 = vmatpush.msra.mxu3 %v605_v1 }
  0x35   : > { %456 = vmatpush.msra.mxu0 %v387_v7  ;;  %495 = vmatpush.msrb.mxu1 %v625_v10 }
  0x36   : > { %435 = vmatpush.msra.mxu3 %v604_v4 }
  0x37   : > { %457 = vmatpush.msra.mxu0 %v386_v9  ;;  %496 = vmatpush.msrb.mxu1 %v624_v12 }
  0x39   : > { %458 = vmatpush.msra.mxu0 %v385_v11  ;;  %497 = vmatpush.msrb.mxu1 %v623_v13 }
  0x3b   : > { %498 = vmatpush.msrb.mxu1 %v622_v14 }
  0x3d   : > { %499 = vmatpush.msrb.mxu1 %v621_v16 }
  0x3f   : > { %500 = vmatpush.msrb.mxu1 %v620_v17 }
  0x9a   : > { %v323_v19 = vpop.f32.mrf.mxu1 }
  0x9f   : > { %v294_v15 = vpop.f32.mrf.mxu2 }
  0xa0   : > { %v324_v20 = vadd.f32 %v323_v19, %v294_v15 }
  0xa2   : > { %v326_v25 = vpop.f32.mrf.mxu1 }
  0xa7   : > { %v297_v18 = vpop.f32.mrf.mxu2 }
  0xa8   : > { %v327_v27 = vadd.f32 %v326_v25, %v297_v18 }
  0xaf   : > { %v363_v22 = vpop.f32.mrf.mxu2 }
  0xb0   : > { %v369_v23 = vadd.f32 %v363_v22, %v324_v20 }
  0xb2   : > { %v375_v24 = vadd.f32 %v662_v21, %v369_v23 }
  0xb4   : > { %v377_v26 = vmax.f32 %v375_v24, 0.0 }
  0xb6   : > { %381 = vst [vmem:[#allocation3 + $0x1] sm:$0xff] %v377_v26  ;;  %436 = vmatmul.f32.vlgmr.msra.gmra.mxu3 %v377_v26 }
  0xb7   : > { %v366_v28 = vpop.f32.mrf.mxu2 }
  0xb8   : > { %v370_v29 = vadd.f32 %v366_v28, %v327_v27 }
  0xba   : > { %v376_v30 = vadd.f32 %v662_v21, %v370_v29 }
  0xbc   : > { %v378_v31 = vmax.f32 %v376_v30, 0.0 }
  0xbd   : > { %v383_v32 = vld [vmem:[#allocation3] sm:$0xff] }
  0xbe   : > { %382 = vst [vmem:[#allocation3 + $0x9] sm:$0xff] %v378_v31  ;;  %459 = vmatmul.f32.vlgmr.msra.gmra.mxu0 %v383_v32  ;;  %439 = vmatmul.f32.gmra.mxu3 %v378_v31 }
  0xc5   : > { %v384_v33 = vld [vmem:[#allocation3 + $0x8] sm:$0xff] }
  0xc6   : > { %v466_v34 = vld [vmem:[#allocation3 + $0x2] sm:$0xff]  ;;  %462 = vmatmul.f32.gmra.mxu0 %v384_v33  ;;  %v467_v35 = vld [vmem:[#allocation3 + $0xa] sm:$0xff] }
  0xc7   : > { %501 = vmatmul.f32.vlgmr.msrb.gmra.mxu1 %v466_v34 }
  0xcf   : > { %504 = vmatmul.f32.gmra.mxu1 %v467_v35 }
 0x139   : > { %v437_v37 = vpop.f32.mrf.mxu3 }
 0x13b   : > { %v460_v36 = vpop.f32.mrf.mxu0 }
 0x13c   : > { %v461_v38 = vadd.f32 %v460_v36, %v437_v37 }
 0x141   : > { %v440_v45 = vpop.f32.mrf.mxu3 }
 0x143   : > { %v463_v43 = vpop.f32.mrf.mxu0 }
 0x144   : > { %v502_v40 = vpop.f32.mrf.mxu1  ;;  %v464_v46 = vadd.f32 %v463_v43, %v440_v45 }
 0x145   : > { %v508_v41 = vadd.f32 %v502_v40, %v461_v38 }
 0x147   : > { %v514_v42 = vadd.f32 %v663_v39, %v508_v41 }
 0x149   : > { %v516_v44 = vmax.f32 %v514_v42, 0.0 }
 0x14b   : > { %518 = vst [vmem:[%s241_s21] sm:$0xff] %v516_v44 }
 0x14c   : > { %v505_v47 = vpop.f32.mrf.mxu1 }
 0x14d   : > { %v509_v48 = vadd.f32 %v505_v47, %v464_v46 }
 0x14f   : > { %v515_v49 = vadd.f32 %v663_v39, %v509_v48 }
 0x151   : > { %v517_v50 = vmax.f32 %v515_v49, 0.0 }
 0x153   : > { %519 = vst [vmem:[%s241_s21 + $0x8] sm:$0xff] %v517_v50 }
 0x154 PF: > { %s16_s18 = sadd.s32 1, %s704_s18  }
 0x155   : > { %p13_p7 = scmp.ge.s32.totalorder %s16_s18, 4  }
 0x157   :  { %15 = sbr.rel (!%p13_p7) target bundleno = 1 (0x1), region = 79 }
 0x15c   :  { %541 = vsyncpa [#allocation5], 1 }
 0x15d   :  { %543 = vsyncpa [#allocation5 + $0x1], 1 }

</bundles_post_ra>
